<compile_context>
chip_gen: v5e
topology: v5e:2x2
jax: 0.10.0
libtpu: 0.0.40
codegen_flags: <defaults>
</compile_context>

<pallas_src>
import jax
import jax.numpy as jnp
import numpy as np
from jax.experimental import pallas as pl
from jax.experimental.pallas import tpu as pltpu


# ----------------------------------------------------------------------------- kernel factory

def _make_kernel(include_physics, include_bc, *, dP_scale, std_target, mean_target,
                 zb_target, w_data, w_physics, w_bc):
    """Build a trace-time-specialized fused-loss kernel.

    All keyword args are Python floats and fold to immediates at trace time; only the
    traced params (b2, k) are passed at runtime via the SMEM scalar vector.
    """
    dP_scale = float(dP_scale)
    std_target = float(std_target)
    mean_target = float(mean_target)
    zb_target = float(zb_target)
    w_data = float(w_data)
    w_physics = float(w_physics)
    w_bc = float(w_bc)

    def kernel(*refs):
        it = iter(refs)
        s_ref = next(it)        # SMEM f32[2] = [b2, k]
        w1T_ref = next(it)      # (H, F)   first-layer weights, transposed
        b1_ref = next(it)       # (H, 1)   first-layer bias (column)
        w2r_ref = next(it)      # (1, H)   second-layer weights (row)
        xT_ref = next(it)       # (F, Nb)  data inputs, transposed
        tT_ref = next(it)       # (1, Nb)  data targets, transposed
        w1p_ref = next(it) if include_physics else None   # (1, H)  first row of w1
        cT_ref = next(it) if include_physics else None    # (F, Nc) collocation pts, transposed
        bT_ref = next(it) if include_bc else None         # (F, Nbc) boundary pts, transposed
        out_ref = next(it)      # (1, 1)   total loss (VMEM)

        b2 = s_ref[0]
        w1T = w1T_ref[...]
        b1 = b1_ref[...]
        w2r = w2r_ref[...]

        def hidden(xT):
            # First layer on the idle MXU: (H,F)@(F,N); K=F zero-pads for free.
            pre = jnp.dot(w1T, xT, preferred_element_type=jnp.float32) + b1
            return jnp.tanh(pre)                                          # EUP

        def head(t):
            # z = w2^T t + b2 as a (1,H)@(H,N) MXU dot (no sublane XLU reduce tree).
            return jnp.dot(w2r, t, preferred_element_type=jnp.float32) + b2   # (1, N)

        # ---------------- data MSE ----------------
        t_d = hidden(xT_ref[...])
        d = head(t_d) - tT_ref[...]
        total = w_data * jnp.sum(d * d, keepdims=True)                    # (1, 1)

        # ---------------- physics residual ----------------
        if include_physics:
            k_phys = s_ref[1]
            t_c = hidden(cT_ref[...])
            z_c = head(t_c)                                               # (1, Nc)
            # analytic dz/dP for the tanh MLP, as another (1,H)@(H,Nc) MXU dot:
            #   dz/dP = sum_h w1[0,h] * w2[h] * (1 - tanh^2)
            g_row = w1p_ref[...] * w2r                                    # (1, H)
            dz_dP = jnp.dot(g_row, 1.0 - t_c * t_c,
                            preferred_element_type=jnp.float32)           # (1, Nc)
            r = dP_scale * dz_dP + k_phys * (std_target * z_c + mean_target)
            total = total + w_physics * jnp.sum(r * r, keepdims=True)

        # ---------------- boundary MSE ----------------
        if include_bc:
            t_b = hidden(bT_ref[...])
            e = head(t_b) - zb_target
            total = total + w_bc * jnp.sum(e * e, keepdims=True)

        out_ref[...] = total

    return kernel


# ----------------------------------------------------------------------------- wrapper

def _fused_loss(kernel, args):
    vmem = pl.BlockSpec(memory_space=pltpu.MemorySpace.VMEM)
    smem = pl.BlockSpec(memory_space=pltpu.MemorySpace.SMEM)
    in_specs = [smem] + [vmem] * (len(args) - 1)
    out = pl.pallas_call(
        kernel,
        out_shape=jax.ShapeDtypeStruct((1, 1), jnp.float32),
        in_specs=in_specs,
        out_specs=vmem,
    )(*args)
    return out[0, 0]


# ----------------------------------------------------------------------------- loss module

class DistanceLossPallas:
    def __init__(self, lambda_data, lambda_physics, lambda_bc, n_collocation=1024,
                 mean_input=None, std_input=None, mean_target=None, std_target=None):
        if lambda_data < 0.0 or lambda_physics < 0.0 or lambda_bc < 0.0:
            raise ValueError('Lambda weights must be non-negative.')
        self.lambda_data = float(lambda_data)
        self.lambda_physics = float(lambda_physics)
        self.lambda_bc = float(lambda_bc)
        # perf note: keep n_collocation a multiple of 128 for lane-dense (points-on-lanes) layout.
        self.n_collocation = int(n_collocation)
        self.mean_input = jnp.zeros((1,), jnp.float32) if mean_input is None else jnp.asarray(mean_input, jnp.float32)
        self.std_input = jnp.ones((1,), jnp.float32) if std_input is None else jnp.asarray(std_input, jnp.float32)
        self.mean_target = 0.0 if mean_target is None else float(mean_target)
        self.std_target = 1.0 if std_target is None else float(std_target)
        # concrete (non-traced) values baked into the kernel as immediates
        self._std_input0 = float(self.std_input[0])

    # points are generated directly in transposed (features, points) layout
    def collocation_points(self, key, n_features):
        k1, k2 = jax.random.split(key)
        P = -3.0 + 6.0 * jax.random.uniform(k1, (1, self.n_collocation), jnp.float32)
        a = -3.0 + 6.0 * jax.random.uniform(k2, (n_features - 1, self.n_collocation), jnp.float32)
        return P, jnp.concatenate([P, a], axis=0)

    def boundary_collocation_points(self, key, rss_1m, n_features):
        P0 = (rss_1m - self.mean_input[:1]) / self.std_input[:1]            # (1,)
        P0 = jnp.ones((1, self.n_collocation), jnp.float32) * P0[:, None]   # einsum 'h,nh->nh'
        a = -3.0 + 6.0 * jax.random.uniform(key, (n_features - 1, self.n_collocation), jnp.float32)
        return jnp.concatenate([P0, a], axis=0)

    def forward(self, params, inputs, targets, key):
        w1, b1, w2, b2 = params["w1"], params["b1"], params["w2"], params["b2"]
        n_feat = inputs.shape[-1]
        n_batch = inputs.shape[0]

        include_physics = self.lambda_physics != 0.0
        include_bc = include_physics and (self.lambda_bc != 0.0)

        # wrapper-side layout plumbing only (lane-dense: points on lanes)
        w1T = w1.T.astype(jnp.float32)                  # (H, F)
        b1c = b1.reshape(-1, 1).astype(jnp.float32)     # (H, 1)
        w2r = w2.reshape(1, -1).astype(jnp.float32)     # (1, H)
        xT = inputs.T.astype(jnp.float32)               # (F, Nb)
        tT = targets.T.astype(jnp.float32)              # (1, Nb)

        if include_physics:
            scalars = jnp.concatenate(
                [b2.reshape(-1), params["k"].reshape(-1)]).astype(jnp.float32)   # [b2, k]
        else:
            scalars = jnp.concatenate(
                [b2.reshape(-1), jnp.zeros((1,), jnp.float32)]).astype(jnp.float32)

        args = [scalars, w1T, b1c, w2r, xT, tT]

        if not include_physics:
            # original semantics: plain (unweighted) data MSE; data-only specialized kernel.
            kernel = _make_kernel(
                False, False,
                dP_scale=0.0, std_target=self.std_target, mean_target=self.mean_target,
                zb_target=0.0, w_data=1.0 / n_batch, w_physics=0.0, w_bc=0.0)
            return _fused_loss(kernel, args)

        k_coll, k_bc = jax.random.split(key)
        _, cT = self.collocation_points(k_coll, n_feat)                  # (F, Nc)
        args += [w1[0:1, :].astype(jnp.float32), cT]                     # (1, H), (F, Nc)

        if include_bc:
            bT = self.boundary_collocation_points(k_bc, params["rss_1m"], n_feat)
            args += [bT]

        zb_tgt = (1.0 - self.mean_target) / self.std_target
        kernel = _make_kernel(
            True, include_bc,
            dP_scale=self.std_target / self._std_input0,
            std_target=self.std_target, mean_target=self.mean_target, zb_target=zb_tgt,
            w_data=self.lambda_data / n_batch,
            w_physics=self.lambda_physics / self.n_collocation,
            w_bc=(self.lambda_bc / self.n_collocation) if include_bc else 0.0)
        return _fused_loss(kernel, args)


# ----------------------------------------------------------------------------- main

if __name__ == "__main__":
    key = jax.random.PRNGKey(0)
    k_w1, k_w2, k_x, k_y, k_fwd = jax.random.split(key, 5)

    BATCH, F, H, N_COLL = 8, 4, 32, 128

    params = {
        "w1": 0.3 * jax.random.normal(k_w1, (F, H), jnp.float32),
        "b1": jnp.zeros((1, H), jnp.float32),
        "w2": 0.3 * jax.random.normal(k_w2, (H, 1), jnp.float32),
        "b2": jnp.zeros((1, 1), jnp.float32),
        "k": jnp.array([0.05], jnp.float32),
        "rss_1m": jnp.array([-40.0], jnp.float32),
    }

    inputs = jax.random.normal(k_x, (BATCH, F), jnp.float32)
    targets = jax.random.normal(k_y, (BATCH, 1), jnp.float32)

    norm_kwargs = dict(
        mean_input=jnp.array([-60.0, 0.0, 0.0, 0.0]),
        std_input=jnp.array([10.0, 1.0, 1.0, 1.0]),
        mean_target=2.0, std_target=1.5,
    )

    loss_mod = DistanceLossPallas(
        lambda_data=1.0, lambda_physics=0.5, lambda_bc=0.1, n_collocation=N_COLL, **norm_kwargs)

    loss = loss_mod.forward(params, inputs, targets, k_fwd)
    loss = jax.block_until_ready(loss)

    # ----- pure-JAX reference (uses jax.jvp for dz/dP, i.e. real autodiff) -----
    def mlp(x):
        return jnp.tanh(x @ params["w1"] + params["b1"]) @ params["w2"] + params["b2"]

    data_loss_ref = jnp.mean((mlp(inputs) - targets) ** 2)

    k_coll, k_bc = jax.random.split(k_fwd)
    _, cT_ref = loss_mod.collocation_points(k_coll, F)
    coll = cT_ref.T
    tangent = jnp.concatenate(
        [jnp.ones((N_COLL, 1), jnp.float32), jnp.zeros((N_COLL, F - 1), jnp.float32)], axis=1)
    z_coll, dz_dP = jax.jvp(mlp, (coll,), (tangent,))
    dz_dP = loss_mod.std_target / loss_mod.std_input[0] * dz_dP
    z_coll = loss_mod.std_target * z_coll + loss_mod.mean_target
    residual = dz_dP + params["k"][0] * z_coll
    physics_loss_ref = jnp.mean(residual ** 2)

    boundary = loss_mod.boundary_collocation_points(k_bc, params["rss_1m"], F).T
    z_b = mlp(boundary)
    z_b_target = (jnp.ones_like(z_b) - loss_mod.mean_target) / loss_mod.std_target
    boundary_loss_ref = jnp.mean((z_b - z_b_target) ** 2)

    loss_ref = (loss_mod.lambda_data * data_loss_ref
                + loss_mod.lambda_physics * physics_loss_ref
                + loss_mod.lambda_bc * boundary_loss_ref)

    np.testing.assert_allclose(np.asarray(loss), np.asarray(loss_ref), rtol=1e-2, atol=1e-3)

    # ----- trace-time-specialized variants (no dummy-branch work) -----
    # data-only (lambda_physics == 0): plain unweighted MSE
    loss_mod_d = DistanceLossPallas(1.0, 0.0, 0.0, n_collocation=N_COLL, **norm_kwargs)
    loss_d = jax.block_until_ready(loss_mod_d.forward(params, inputs, targets, k_fwd))
    np.testing.assert_allclose(np.asarray(loss_d), np.asarray(data_loss_ref), rtol=1e-2, atol=1e-3)

    # data + physics (lambda_bc == 0)
    loss_mod_dp = DistanceLossPallas(1.0, 0.5, 0.0, n_collocation=N_COLL, **norm_kwargs)
    loss_dp = jax.block_until_ready(loss_mod_dp.forward(params, inputs, targets, k_fwd))
    loss_dp_ref = 1.0 * data_loss_ref + 0.5 * physics_loss_ref
    np.testing.assert_allclose(np.asarray(loss_dp), np.asarray(loss_dp_ref), rtol=1e-2, atol=1e-3)

    print("KERNEL_OK")
</pallas_src>

<mosaic_0001>
module attributes {stable_mosaic.version = 11 : i64} {
  func.func @kernel(%arg0: memref<2xf32, #tpu.memory_space<smem>>, %arg1: memref<32x4xf32, #tpu.memory_space<vmem>>, %arg2: memref<32x1xf32, #tpu.memory_space<vmem>>, %arg3: memref<1x32xf32, #tpu.memory_space<vmem>>, %arg4: memref<4x8xf32, #tpu.memory_space<vmem>>, %arg5: memref<1x8xf32, #tpu.memory_space<vmem>>, %arg6: memref<1x32xf32, #tpu.memory_space<vmem>>, %arg7: memref<4x128xf32, #tpu.memory_space<vmem>>, %arg8: memref<4x128xf32, #tpu.memory_space<vmem>>, %arg9: memref<1x1xf32, #tpu.memory_space<vmem>>) attributes {dimension_semantics = [], scalar_prefetch = 0 : i64, scratch_operands = 0 : i64, tpu.core_type = #tpu.core_type<tc>} {
    %c0 = arith.constant 0 : index
    %0 = memref.load %arg0[%c0] : memref<2xf32, #tpu.memory_space<smem>>
    %c0_0 = arith.constant 0 : index
    %c0_1 = arith.constant 0 : index
    %1 = vector.load %arg1[%c0_0, %c0_1] : memref<32x4xf32, #tpu.memory_space<vmem>>, vector<32x4xf32>
    %c0_2 = arith.constant 0 : index
    %c0_3 = arith.constant 0 : index
    %2 = vector.load %arg2[%c0_2, %c0_3] : memref<32x1xf32, #tpu.memory_space<vmem>>, vector<32x1xf32>
    %c0_4 = arith.constant 0 : index
    %c0_5 = arith.constant 0 : index
    %3 = vector.load %arg3[%c0_4, %c0_5] : memref<1x32xf32, #tpu.memory_space<vmem>>, vector<1x32xf32>
    %c0_6 = arith.constant 0 : index
    %c0_7 = arith.constant 0 : index
    %4 = vector.load %arg4[%c0_6, %c0_7] : memref<4x8xf32, #tpu.memory_space<vmem>>, vector<4x8xf32>
    %cst = arith.constant dense<0.000000e+00> : vector<32x8xf32>
    %5 = tpu.matmul %1, %4, %cst {dimension_numbers = #tpu.dot_dimension_numbers<[1], [0], [0], [1], [0, 0, 1, 1], [], []>} : vector<32x4xf32>, vector<4x8xf32>, vector<32x8xf32> -> vector<32x8xf32>
    %6 = vector.broadcast %2 : vector<32x1xf32> to vector<32x8xf32>
    %7 = arith.addf %5, %6 : vector<32x8xf32>
    %8 = math.tanh %7 : vector<32x8xf32>
    %cst_8 = arith.constant dense<0.000000e+00> : vector<1x8xf32>
    %9 = tpu.matmul %3, %8, %cst_8 {dimension_numbers = #tpu.dot_dimension_numbers<[1], [0], [0], [1], [0, 0, 1, 1], [], []>} : vector<1x32xf32>, vector<32x8xf32>, vector<1x8xf32> -> vector<1x8xf32>
    %10 = vector.broadcast %0 : f32 to vector<1x8xf32>
    %11 = arith.addf %9, %10 : vector<1x8xf32>
    %c0_9 = arith.constant 0 : index
    %c0_10 = arith.constant 0 : index
    %12 = vector.load %arg5[%c0_9, %c0_10] : memref<1x8xf32, #tpu.memory_space<vmem>>, vector<1x8xf32>
    %13 = arith.subf %11, %12 : vector<1x8xf32>
    %14 = arith.mulf %13, %13 : vector<1x8xf32>
    %15 = vector.shape_cast %14 : vector<1x8xf32> to vector<1x1x8xf32>
    %cst_11 = arith.constant dense<0.000000e+00> : vector<1xf32>
    %16 = vector.multi_reduction <add>, %15, %cst_11 [1, 2] : vector<1x1x8xf32> to vector<1xf32>
    %17 = vector.shape_cast %16 : vector<1xf32> to vector<1x1x1xf32>
    %18 = vector.extract %17[0, 0, 0] : f32 from vector<1x1x1xf32>
    %19 = vector.broadcast %18 : f32 to vector<1x1xf32>
    %cst_12 = arith.constant 1.250000e-01 : f32
    %20 = vector.broadcast %cst_12 : f32 to vector<1x1xf32>
    %21 = arith.mulf %20, %19 : vector<1x1xf32>
    %c1 = arith.constant 1 : index
    %22 = memref.load %arg0[%c1] : memref<2xf32, #tpu.memory_space<smem>>
    %c0_13 = arith.constant 0 : index
    %c0_14 = arith.constant 0 : index
    %23 = vector.load %arg7[%c0_13, %c0_14] : memref<4x128xf32, #tpu.memory_space<vmem>>, vector<4x128xf32>
    %cst_15 = arith.constant dense<0.000000e+00> : vector<32x128xf32>
    %24 = tpu.matmul %1, %23, %cst_15 {dimension_numbers = #tpu.dot_dimension_numbers<[1], [0], [0], [1], [0, 0, 1, 1], [], []>} : vector<32x4xf32>, vector<4x128xf32>, vector<32x128xf32> -> vector<32x128xf32>
    %25 = vector.broadcast %2 : vector<32x1xf32> to vector<32x128xf32>
    %26 = arith.addf %24, %25 : vector<32x128xf32>
    %27 = math.tanh %26 : vector<32x128xf32>
    %cst_16 = arith.constant dense<0.000000e+00> : vector<1x128xf32>
    %28 = tpu.matmul %3, %27, %cst_16 {dimension_numbers = #tpu.dot_dimension_numbers<[1], [0], [0], [1], [0, 0, 1, 1], [], []>} : vector<1x32xf32>, vector<32x128xf32>, vector<1x128xf32> -> vector<1x128xf32>
    %29 = vector.broadcast %0 : f32 to vector<1x128xf32>
    %30 = arith.addf %28, %29 : vector<1x128xf32>
    %c0_17 = arith.constant 0 : index
    %c0_18 = arith.constant 0 : index
    %31 = vector.load %arg6[%c0_17, %c0_18] : memref<1x32xf32, #tpu.memory_space<vmem>>, vector<1x32xf32>
    %32 = arith.mulf %31, %3 : vector<1x32xf32>
    %33 = arith.mulf %27, %27 : vector<32x128xf32>
    %cst_19 = arith.constant 1.000000e+00 : f32
    %34 = vector.broadcast %cst_19 : f32 to vector<32x128xf32>
    %35 = arith.subf %34, %33 : vector<32x128xf32>
    %cst_20 = arith.constant dense<0.000000e+00> : vector<1x128xf32>
    %36 = tpu.matmul %32, %35, %cst_20 {dimension_numbers = #tpu.dot_dimension_numbers<[1], [0], [0], [1], [0, 0, 1, 1], [], []>} : vector<1x32xf32>, vector<32x128xf32>, vector<1x128xf32> -> vector<1x128xf32>
    %cst_21 = arith.constant 1.500000e-01 : f32
    %37 = vector.broadcast %cst_21 : f32 to vector<1x128xf32>
    %38 = arith.mulf %37, %36 : vector<1x128xf32>
    %cst_22 = arith.constant 1.500000e+00 : f32
    %39 = vector.broadcast %cst_22 : f32 to vector<1x128xf32>
    %40 = arith.mulf %39, %30 : vector<1x128xf32>
    %cst_23 = arith.constant 2.000000e+00 : f32
    %41 = vector.broadcast %cst_23 : f32 to vector<1x128xf32>
    %42 = arith.addf %40, %41 : vector<1x128xf32>
    %43 = vector.broadcast %22 : f32 to vector<1x128xf32>
    %44 = arith.mulf %43, %42 : vector<1x128xf32>
    %45 = arith.addf %38, %44 : vector<1x128xf32>
    %46 = arith.mulf %45, %45 : vector<1x128xf32>
    %47 = vector.shape_cast %46 : vector<1x128xf32> to vector<1x1x128xf32>
    %cst_24 = arith.constant dense<0.000000e+00> : vector<1xf32>
    %48 = vector.multi_reduction <add>, %47, %cst_24 [1, 2] : vector<1x1x128xf32> to vector<1xf32>
    %49 = vector.shape_cast %48 : vector<1xf32> to vector<1x1x1xf32>
    %50 = vector.extract %49[0, 0, 0] : f32 from vector<1x1x1xf32>
    %51 = vector.broadcast %50 : f32 to vector<1x1xf32>
    %cst_25 = arith.constant 3.906250e-03 : f32
    %52 = vector.broadcast %cst_25 : f32 to vector<1x1xf32>
    %53 = arith.mulf %52, %51 : vector<1x1xf32>
    %54 = arith.addf %21, %53 : vector<1x1xf32>
    %c0_26 = arith.constant 0 : index
    %c0_27 = arith.constant 0 : index
    %55 = vector.load %arg8[%c0_26, %c0_27] : memref<4x128xf32, #tpu.memory_space<vmem>>, vector<4x128xf32>
    %cst_28 = arith.constant dense<0.000000e+00> : vector<32x128xf32>
    %56 = tpu.matmul %1, %55, %cst_28 {dimension_numbers = #tpu.dot_dimension_numbers<[1], [0], [0], [1], [0, 0, 1, 1], [], []>} : vector<32x4xf32>, vector<4x128xf32>, vector<32x128xf32> -> vector<32x128xf32>
    %57 = vector.broadcast %2 : vector<32x1xf32> to vector<32x128xf32>
    %58 = arith.addf %56, %57 : vector<32x128xf32>
    %59 = math.tanh %58 : vector<32x128xf32>
    %cst_29 = arith.constant dense<0.000000e+00> : vector<1x128xf32>
    %60 = tpu.matmul %3, %59, %cst_29 {dimension_numbers = #tpu.dot_dimension_numbers<[1], [0], [0], [1], [0, 0, 1, 1], [], []>} : vector<1x32xf32>, vector<32x128xf32>, vector<1x128xf32> -> vector<1x128xf32>
    %61 = vector.broadcast %0 : f32 to vector<1x128xf32>
    %62 = arith.addf %60, %61 : vector<1x128xf32>
    %cst_30 = arith.constant -0.666666686 : f32
    %63 = vector.broadcast %cst_30 : f32 to vector<1x128xf32>
    %64 = arith.subf %62, %63 : vector<1x128xf32>
    %65 = arith.mulf %64, %64 : vector<1x128xf32>
    %66 = vector.shape_cast %65 : vector<1x128xf32> to vector<1x1x128xf32>
    %cst_31 = arith.constant dense<0.000000e+00> : vector<1xf32>
    %67 = vector.multi_reduction <add>, %66, %cst_31 [1, 2] : vector<1x1x128xf32> to vector<1xf32>
    %68 = vector.shape_cast %67 : vector<1xf32> to vector<1x1x1xf32>
    %69 = vector.extract %68[0, 0, 0] : f32 from vector<1x1x1xf32>
    %70 = vector.broadcast %69 : f32 to vector<1x1xf32>
    %cst_32 = arith.constant 7.812500e-04 : f32
    %71 = vector.broadcast %cst_32 : f32 to vector<1x1xf32>
    %72 = arith.mulf %71, %70 : vector<1x1xf32>
    %73 = arith.addf %54, %72 : vector<1x1xf32>
    %c0_33 = arith.constant 0 : index
    %c0_34 = arith.constant 0 : index
    %74 = vector.load %arg9[%c0_33, %c0_34] : memref<1x1xf32, #tpu.memory_space<vmem>>, vector<1x1xf32>
    tpu.vector_store %arg9[%c0_33, %c0_34], %73 {strides = array<i32>} : memref<1x1xf32, #tpu.memory_space<vmem>>, vector<1x1xf32>,
    return
  }
}

</mosaic_0001>

<bundles_post_ra>
// kernel: tpu_custom_call.1
= control target key start
LH: loop header
LB: loop body
LE: loop exit
PB: predicated region body
PF: predicated region fallthrough
CT: control target
= control target key end

     0   :  { %14 = vsyncpa [#allocation4], 0  ;;  %s584_s0 = inlined_call_operand.vmem [shape: f32[2], index: 0, kind: input, shape index: {}]   ;;  %s585_s1 = inlined_call_operand.vmem [shape: f32[32,4], index: 1, kind: input, shape index: {}]   ;;  %s586_s2 = inlined_call_operand.vmem [shape: f32[32,1], index: 2, kind: input, shape index: {}]   ;;  %s587_s3 = inlined_call_operand.vmem [shape: f32[1,32], index: 3, kind: input, shape index: {}]   ;;  %s588_s4 = inlined_call_operand.vmem [shape: f32[4,8], index: 4, kind: input, shape index: {}]   ;;  %s589_s5 = inlined_call_operand.vmem [shape: f32[1,8], index: 5, kind: input, shape index: {}]   ;;  %s590_s6 = inlined_call_operand.vmem [shape: f32[1,32], index: 6, kind: input, shape index: {}]   ;;  %s591_s7 = inlined_call_operand.vmem [shape: f32[4,128], index: 7, kind: input, shape index: {}]   ;;  %s592_s8 = inlined_call_operand.vmem [shape: f32[4,128], index: 8, kind: input, shape index: {}]   ;;  %s593_s9 = inlined_call_operand.hbm [shape: f32[1,1], index: 9, kind: output, shape index: {}]  }
   0x1   :  { %15 = vsyncpa [#allocation3], 0  ;;  %s21_s11 = sshll.u32 %s584_s0, 4  ;;  %s467_s12 = smov [#allocation2]   ;;  %s22_s11 = int_to_ptr.vmem [resolvable:$true] %s21_s11 }
   0x2   :  { %24 = dma.vmem_to_smem %s22_s11, 16, %s467_s12, [#allocation4]  }
   0x3   :  { %463 = dma.done.wait [#allocation4], 16  }
   0x4   :  { %464 = vsyncadd [#allocation4], 4294967280 }
   0x5   :  { %45 = sfence }
   0x6   :  { %v56_v0 = vld [vmem:[%s588_s4] sm:$0xf]  ;;  %vm90_vm0 = vcmask 1043456   ;;  %vm77_vm1 = vcmask 31744   ;;  %v52_v4 = vld [vmem:[%s586_s2 + $0x8] sm:$0xff]  ;;  %v54_v5 = vld [vmem:[%s586_s2 + $0x18] sm:$0xff] }
   0x7   :  { %v169_v1 = vld [vmem:[%s591_s7] sm:$0xf]  ;;  %371 = vmatpush.msk.msra.mxu0 %vm90_vm0, %v56_v0  ;;  %v468_v6 = vmov 0   ;;  %v48_v7 = vld [vmem:[%s585_s1 + $0x8] sm:$0xff]  ;;  %v53_v9 = vld [vmem:[%s586_s2 + $0x10] sm:$0xff]  ;;  %vm128_vm2 = vcmask 261120  }
   0x8   :  { %v47_v2 = vld [vmem:[%s585_s1] sm:$0xff]  ;;  %378 = vmatpush.msk.msra.mxu2 %vm90_vm0, %v169_v1  ;;  %402 = vset.pattern.permute.xlu1 %v468_v6  ;;  %v49_v10 = vld [vmem:[%s585_s1 + $0x10] sm:$0xff]  ;;  %v50_v11 = vld [vmem:[%s585_s1 + $0x18] sm:$0xff]  ;;  %vm155_vm3 = vcmask 57344   ;;  %s377_s13 = sld [smem:[#allocation2 + $0x1]]  ;;  %vm266_vm4 = vcmask 1040384  }
   0x9   :  { %v280_v3 = vld [vmem:[%s592_s8] sm:$0xf]  ;;  %372 = vmatmul.msk.f32.vlgmr.msra.gmra.mxu0 %vm77_vm1, %v47_v2  ;;  %379 = vmatmul.msk.f32.vlgmr.msra.gmra.mxu2 %vm77_vm1, %v47_v2  ;;  %s469_s16 = smov [#allocation5]   ;;  %s361_s19 = sshll.u32 %s593_s9, 4  ;;  %vm352_vm5 = vcmask 0   ;;  %s362_s19 = int_to_ptr.hbm [resolvable:$true] %s361_s19 }
   0xa   :  { %385 = vmatpush.msk.msra.mxu3 %vm90_vm0, %v280_v3  ;;  %401 = vset.pattern.permute.xlu0 %v468_v6  ;;  %v51_v8 = vld [vmem:[%s586_s2] sm:$0xff]  ;;  %s359_s17 = sshll.u32 %s469_s16, 4  ;;  %s360_s17 = int_to_ptr.vmem [resolvable:$true] %s359_s17 }
   0xb   :  { %386 = vmatmul.msk.f32.vlgmr.msra.gmra.mxu3 %vm77_vm1, %v47_v2  ;;  %64 = vperm.xlu1 %402, %v52_v4   ;;  %v55_v39 = vld [vmem:[%s587_s3] sm:$0x1] }
   0xc   :  { %74 = vperm.xlu0 %401, %v54_v5   ;;  %v226_v54 = vld [vmem:[%s590_s6] sm:$0x1]  ;;  %s46_s6 = sld [smem:[#allocation2]] }
   0xd   :  { %v227_v58 = vmul.f32 %v226_v54, %v55_v39  ;;  %v152_v1 = vld [vmem:[%s589_s5] sm:$0x1] }
  0x11   :  { %373 = vmatmul.msk.f32.gmra.mxu0 %vm77_vm1, %v48_v7  ;;  %380 = vmatmul.msk.f32.gmra.mxu2 %vm77_vm1, %v48_v7 }
  0x12   :  { %v127_v63 = vstv %s46_s6 }
  0x13   :  { %387 = vmatmul.msk.f32.gmra.mxu3 %vm77_vm1, %v48_v7  ;;  %59 = vperm.xlu1 %402, %v51_v8  }
  0x14   :  { %69 = vperm.xlu0 %401, %v53_v9  }
  0x19   :  { %374 = vmatmul.msk.f32.gmra.mxu0 %vm77_vm1, %v49_v10  ;;  %381 = vmatmul.msk.f32.gmra.mxu2 %vm77_vm1, %v49_v10 }
  0x1b   :  { %388 = vmatmul.msk.f32.gmra.mxu3 %vm77_vm1, %v49_v10  ;;  %v262_v10 = vstv %s377_s13 }
  0x21   :  { %375 = vmatmul.msk.f32.gmra.mxu0 %vm77_vm1, %v50_v11  ;;  %382 = vmatmul.msk.f32.gmra.mxu2 %vm77_vm1, %v50_v11 }
  0x23   :  { %389 = vmatmul.msk.f32.gmra.mxu3 %vm77_vm1, %v50_v11 }
  0x7d   :  { %v65_v18 = vpop.permute.xlu1 %64 }
  0x7e   :  { %v75_v15 = vpop.permute.xlu0 %74 }
  0x85   :  { %v60_v25 = vpop.permute.xlu1 %59 }
  0x86   :  { %v111_v12 = vpop.f32.mrf.mxu0  ;;  %v70_v20 = vpop.permute.xlu0 %69 }
  0x87   :  { %v112_v28 = vadd.f32 %v111_v12, %v60_v25 }
  0x8c   :  { %v190_v13 = vpop.f32.mrf.mxu2 }
  0x8d   :  { %v191_v36 = vadd.f32 %v190_v13, %v60_v25 }
  0x8e   :  { %v114_v14 = vpop.f32.mrf.mxu0  ;;  %v301_v16 = vpop.f32.mrf.mxu3 }
  0x8f   :  { %v115_v27 = vadd.f32 %v114_v14, %v65_v18  ;;  %v302_v56 = vadd.f32 %v301_v16, %v60_v25 }
  0x94   :  { %v193_v17 = vpop.f32.mrf.mxu2 }
  0x95   :  { %v194_v34 = vadd.f32 %v193_v17, %v65_v18 }
  0x96   :  { %v117_v19 = vpop.f32.mrf.mxu0  ;;  %v304_v21 = vpop.f32.mrf.mxu3 }
  0x97   :  { %v118_v26 = vadd.f32 %v117_v19, %v70_v20  ;;  %v305_v53 = vadd.f32 %v304_v21, %v65_v18 }
  0x9c   :  { %v196_v22 = vpop.f32.mrf.mxu2 }
  0x9d   :  { %v197_v31 = vadd.f32 %v196_v22, %v70_v20 }
  0x9e   :  { %v120_v23 = vpop.f32.mrf.mxu0  ;;  %v307_v32 = vpop.f32.mrf.mxu3 }
  0x9f   :  { %v121_v24 = vadd.f32 %v120_v23, %v75_v15  ;;  %v308_v50 = vadd.f32 %v307_v32, %v70_v20 }
  0xa1   :  { %403 = vtanh.f32 %v121_v24 }
  0xa2   :  { %405 = vtanh.f32 %v118_v26 }
  0xa3   :  { %407 = vtanh.f32 %v115_v27 }
  0xa4   :  { %v199_v29 = vpop.f32.mrf.mxu2  ;;  %409 = vtanh.f32 %v112_v28 }
  0xa5   :  { %v200_v30 = vadd.f32 %v199_v29, %v75_v15 }
  0xa6   :  { %v310_v42 = vpop.f32.mrf.mxu3 }
  0xa7   :  { %v404_v33 = vpop.eup %403  ;;  %411 = vtanh.f32 %v200_v30  ;;  %v311_v45 = vadd.f32 %v310_v42, %v75_v15 }
  0xa8   :  { %144 = vmatpush.msra.mxu1 %v404_v33  ;;  %v406_v35 = vpop.eup %405  ;;  %413 = vtanh.f32 %v197_v31 }
  0xa9   :  { %v408_v37 = vpop.eup %407  ;;  %415 = vtanh.f32 %v194_v34 }
  0xaa   :  { %145 = vmatpush.msra.mxu1 %v406_v35  ;;  %v410_v38 = vpop.eup %409  ;;  %417 = vtanh.f32 %v191_v36 }
  0xab   :  { %419 = vtanh.f32 %v311_v45 }
  0xac   :  { %146 = vmatpush.msra.mxu1 %v408_v37  ;;  %421 = vtanh.f32 %v308_v50 }
  0xad   :  { %v412_v40 = vpop.eup %411  ;;  %423 = vtanh.f32 %v305_v53 }
  0xae   :  { %147 = vmatpush.msra.mxu1 %v410_v38  ;;  %v414_v41 = vpop.eup %413  ;;  %v231_v43 = vmul.f32 %v412_v40, %v412_v40  ;;  %425 = vtanh.f32 %v302_v56 }
  0xaf   :  { %376 = vmatmul.msk.f32.vlgmr.msra.gmra.mxu1 %vm128_vm2, %v55_v39  ;;  %v416_v44 = vpop.eup %415  ;;  %v230_v46 = vmul.f32 %v414_v41, %v414_v41 }
  0xb0   :  { %218 = vmatpush.msrb.mxu1 %v412_v40  ;;  %v418_v47 = vpop.eup %417  ;;  %v235_v48 = vsub.f32 1.0, %v231_v43  ;;  %v229_v49 = vmul.f32 %v416_v44, %v416_v44 }
  0xb1   :  { %v234_v51 = vsub.f32 1.0, %v230_v46  ;;  %v228_v52 = vmul.f32 %v418_v47, %v418_v47  ;;  %v420_v59 = vpop.eup %419 }
  0xb2   :  { %219 = vmatpush.msrb.mxu1 %v414_v41  ;;  %v233_v55 = vsub.f32 1.0, %v229_v49  ;;  %v422_v60 = vpop.eup %421 }
  0xb3   :  { %v232_v57 = vsub.f32 1.0, %v228_v52  ;;  %v424_v61 = vpop.eup %423 }
  0xb4   :  { %220 = vmatpush.msrb.mxu1 %v416_v44  ;;  %v426_v62 = vpop.eup %425 }
  0xb6   :  { %221 = vmatpush.msrb.mxu1 %v418_v47 }
  0xb7   :  { %383 = vmatmul.msk.f32.vlgmr.msrb.gmra.mxu1 %vm128_vm2, %v55_v39 }
  0xb8   :  { %251 = vmatpush.msra.mxu1 %v235_v48 }
  0xba   :  { %252 = vmatpush.msra.mxu1 %v234_v51 }
  0xbc   :  { %253 = vmatpush.msra.mxu1 %v233_v55 }
  0xbe   :  { %254 = vmatpush.msra.mxu1 %v232_v57 }
  0xbf   :  { %384 = vmatmul.msk.f32.vlgmr.msra.gmra.mxu1 %vm128_vm2, %v227_v58 }
  0xc0   :  { %329 = vmatpush.msrb.mxu1 %v420_v59 }
  0xc2   :  { %330 = vmatpush.msrb.mxu1 %v422_v60 }
  0xc4   :  { %331 = vmatpush.msrb.mxu1 %v424_v61 }
  0xc6   :  { %332 = vmatpush.msrb.mxu1 %v426_v62 }
  0xc7   :  { %390 = vmatmul.msk.f32.vlgmr.msrb.gmra.mxu1 %vm128_vm2, %v55_v39 }
 0x12c   :  { %v149_v0 = vpop.f32.mrf.mxu1 }
 0x12d   :  { %v150_v2 = vadd.f32 %v149_v0, %v127_v63 }
 0x12f   :  { %v153_v3 = vsub.f32 %v150_v2, %v152_v1 }
 0x131   :  { %v154_v4 = vmul.f32 %v153_v3, %v153_v3 }
 0x133   :  { %v156_v5 = vsel %vm155_vm3, %v154_v4, 0.0 }
 0x134   :  { %157 = vadd.xlane.f32.xlu2 %v156_v5  ;;  %v223_v6 = vpop.f32.mrf.mxu1 }
 0x135   :  { %v224_v7 = vadd.f32 %v223_v6, %v127_v63 }
 0x137   :  { %v260_v8 = vmul.f32 1.5, %v224_v7 }
 0x139   :  { %v261_v9 = vadd.f32 2.0, %v260_v8 }
 0x13b   :  { %v263_v12 = vmul.f32 %v262_v10, %v261_v9 }
 0x13c   :  { %v256_v11 = vpop.f32.mrf.mxu1 }
 0x13d   :  { %v259_v13 = vmul.f32 0.15, %v256_v11 }
 0x13f   :  { %v264_v14 = vadd.f32 %v263_v12, %v259_v13 }
 0x141   :  { %v265_v15 = vmul.f32 %v264_v14, %v264_v14 }
 0x143   :  { %v267_v16 = vsel %vm266_vm4, %v265_v15, 0.0 }
 0x144   :  { %v334_v17 = vpop.f32.mrf.mxu1  ;;  %268 = vadd.xlane.f32.xlu2 %v267_v16 }
 0x145   :  { %v335_v18 = vadd.f32 %v334_v17, %v127_v63 }
 0x147   :  { %v391_v19 = vadd.f32 0.6666667, %v335_v18 }
 0x149   :  { %v338_v20 = vmul.f32 %v391_v19, %v391_v19 }
 0x14b   :  { %v339_v21 = vsel %vm266_vm4, %v338_v20, 0.0 }
 0x14c   :  { %340 = vadd.xlane.f32.xlu0 %v339_v21 }
 0x1a7   :  { %v158_v22 = vpop.xlane.xlu2 %157 }
 0x1a8   :  { %v159_v23 = vrot.slane %v158_v22, 4 }
 0x1aa   :  { %v160_v24 = vadd.f32 %v159_v23, %v158_v22 }
 0x1ac   :  { %v161_v25 = vrot.slane %v160_v24, 2 }
 0x1ae   :  { %v162_v26 = vadd.f32 %v161_v25, %v160_v24 }
 0x1b0   :  { %v163_v27 = vrot.slane %v162_v26, 1 }
 0x1b2   :  { %v164_v28 = vadd.f32 %v163_v27, %v162_v26 }
 0x1b4   :  { %392 = vpush %v164_v28 }
 0x1b7   :  { %v269_v29 = vpop.xlane.xlu2 %268 }
 0x1b8   :  { %v270_v30 = vrot.slane %v269_v29, 4 }
 0x1ba   :  { %v271_v31 = vadd.f32 %v270_v30, %v269_v29 }
 0x1bc   :  { %v272_v32 = vrot.slane %v271_v31, 2 }
 0x1be   :  { %v273_v33 = vadd.f32 %v272_v32, %v271_v31 }
 0x1bf   :  { %v341_v34 = vpop.xlane.xlu0 %340 }
 0x1c0   :  { %v342_v35 = vrot.slane %v341_v34, 4  ;;  %v274_v36 = vrot.slane %v273_v33, 1 }
 0x1c2   :  { %v343_v37 = vadd.f32 %v342_v35, %v341_v34  ;;  %v275_v38 = vadd.f32 %v274_v36, %v273_v33 }
 0x1c4   :  { %v344_v39 = vrot.slane %v343_v37, 2  ;;  %394 = vpush %v275_v38 }
 0x1c6   :  { %v345_v40 = vadd.f32 %v344_v39, %v343_v37 }
 0x1c8   :  { %v346_v41 = vrot.slane %v345_v40, 1 }
 0x1ca   :  { %v347_v42 = vadd.f32 %v346_v41, %v345_v40 }
 0x1cc   :  { %396 = vpush %v347_v42 }
 0x1e5   :  { %s393_s5 = spop %392 }
 0x1e6   :  { %v166_v44 = vstv %s393_s5 }
 0x1e7   :  { %v167_v46 = vmul.f32 0.125, %v166_v44 }
 0x1f5   :  { %s395_s14 = spop %394 }
 0x1f6   :  { %v277_v43 = vstv %s395_s14 }
 0x1f7   :  { %v278_v45 = vmul.f32 0.00390625, %v277_v43 }
 0x1f9   :  { %v279_v48 = vadd.f32 %v278_v45, %v167_v46 }
 0x1fd   :  { %s397_s15 = spop %396 }
 0x1fe   :  { %v349_v47 = vstv %s397_s15 }
 0x1ff   :  { %v350_v49 = vmul.f32 0.00078125, %v349_v47 }
 0x201   :  { %v351_v50 = vadd.f32 %v350_v49, %v279_v48 }
 0x203   :  { %353 = vst.msk [vmem:[#allocation5] sm:$0x1] %vm352_vm5, %v351_v50 }
 0x204   :  { %364 = dma.vmem_to_hbm [thread:$0]  %s360_s17, 16, %s362_s19, [#allocation3]  }
 0x205   :  { %465 = dma.done.wait [#allocation3], 16  }
 0x206   :  { %466 = vsyncadd [#allocation3], 4294967280 }
 0x207   :  { %369 = vsyncpa [#allocation3], 1 }
 0x208   :  { %370 = vsyncpa [#allocation4], 1 }

</bundles_post_ra>
